<compile_context>
chip_gen: v7x
topology: tpu7x:2x2x1
jax: 0.10.0
libtpu: 0.0.40
codegen_flags: <defaults>
</compile_context>

<pallas_src>
import functools

import jax
import jax.numpy as jnp
from jax import lax
from jax.experimental import pallas as pl
from jax.experimental.pallas import tpu as pltpu

_EPS = 1e-5  # nn.BatchNorm1d default eps


def _normalize(x):
    # BatchNorm1d(affine=False) training semantics: per-feature mean and
    # *biased* variance over the batch axis, all in f32.
    m = jnp.mean(x, axis=0, keepdims=True)
    v = jnp.mean((x - m) ** 2, axis=0, keepdims=True)
    return (x - m) * lax.rsqrt(v + _EPS)


def _bn_kernel(x1_ref, x2_ref, x1t_ref, x2n_ref):
    # One O(B*L) pass: normalize both views in f32, emit bf16.
    x1n = _normalize(x1_ref[...].astype(jnp.float32))
    x2n = _normalize(x2_ref[...].astype(jnp.float32))
    # Pre-transpose x1 so the correlation kernel runs a native [tl,B]x[B,tl]
    # matmul with no per-step LHS transpose.
    x1t_ref[...] = x1n.T.astype(jnp.bfloat16)
    x2n_ref[...] = x2n.astype(jnp.bfloat16)


def _corr_kernel(x1t_ref, x2n_ref, out_ref, acc_ref, diag_ref, *,
                 scale_loss, lambd, inv_bl):
    i = pl.program_id(0)          # x1 feature-tile index (outer, "parallel")
    j = pl.program_id(1)          # x2 feature-tile index (inner, "arbitrary")
    nj = pl.num_programs(1)

    @pl.when(j == 0)
    def _init():
        acc_ref[...] = jnp.zeros_like(acc_ref)

    # Raw (unscaled) correlation tile on the MXU, f32 accumulation.
    c = jnp.dot(x1t_ref[...], x2n_ref[...], preferred_element_type=jnp.float32)
    csq = c * c
    # VMEM vector accumulator: scalar reduce + scaling deferred to finalize.
    acc_ref[...] += csq

    @pl.when(i == j)
    def _diag():
        tl = c.shape[0]
        row = lax.broadcasted_iota(jnp.int32, (tl, tl), 0)
        col = lax.broadcasted_iota(jnp.int32, (tl, tl), 1)
        eq = row == col
        # Cancellation-safe on-diagonal term: sum((c_ii - 1)^2) directly.
        on = jnp.sum(jnp.where(eq, (c * inv_bl - 1.0) ** 2, 0.0))
        # Raw sum of squared diagonal (to subtract from the off-diag term).
        dsq = jnp.sum(jnp.where(eq, csq, 0.0))
        diag_ref[0] = on
        diag_ref[1] = dsq

    @pl.when(j == nj - 1)
    def _finalize():
        total_sq = jnp.sum(acc_ref[...])
        off = (total_sq - diag_ref[1]) * (inv_bl * inv_bl)
        out_ref[0, 0] = scale_loss * (diag_ref[0] + lambd * off)


def _vmem_limit_bytes(needed_bytes):
    """Size the scoped-VMEM limit from actual buffers, capped by hardware."""
    limit = max(int(needed_bytes) + (4 << 20), 32 << 20)
    try:
        info = pltpu.get_tpu_info()
        phys = int(getattr(info, "vmem_capacity_bytes", 128 << 20))
        cap = min(96 << 20, (phys * 3) // 4)   # leave headroom below physical
    except Exception:
        cap = 48 << 20                         # safe even on v7x (64 MiB)
    return int(min(limit, cap))


def barlow_twins_loss(x1, x2, *, scale_loss=1.0, lambd=0.1, feature_tile=512):
    """x1, x2: [B, L] arrays. Returns the scalar Barlow Twins loss (float32)."""
    B, L = x1.shape
    assert x2.shape == (B, L)

    # Largest feature tile (multiple of 128) that divides L, else the full L.
    tl = L
    for cand in (int(feature_tile), 512, 256, 128):
        if cand > 0 and L % cand == 0:
            tl = cand
            break
    nt = L // tl

    # ---- Prologue: one-pass batchnorm of both views, bf16 outputs. ----
    bn_vmem = _vmem_limit_bytes(24 * B * tl)   # 2 f32 in + 2 bf16 out, x2 bufs
    x1n_t, x2n = pl.pallas_call(
        _bn_kernel,
        out_shape=(jax.ShapeDtypeStruct((L, B), jnp.bfloat16),
                   jax.ShapeDtypeStruct((B, L), jnp.bfloat16)),
        grid_spec=pltpu.PrefetchScalarGridSpec(
            num_scalar_prefetch=0,
            grid=(nt,),
            in_specs=[pl.BlockSpec((B, tl), lambda i: (0, i)),
                      pl.BlockSpec((B, tl), lambda i: (0, i))],
            out_specs=(pl.BlockSpec((tl, B), lambda i: (i, 0)),
                       pl.BlockSpec((B, tl), lambda i: (0, i))),
        ),
        compiler_params=pltpu.CompilerParams(
            dimension_semantics=("parallel",),
            vmem_limit_bytes=bn_vmem,
        ),
    )(x1, x2)

    # ---- Main kernel: tiled correlation + loss partials per i-tile. ----
    kernel = functools.partial(
        _corr_kernel,
        scale_loss=float(scale_loss),
        lambd=float(lambd),
        inv_bl=1.0 / float(B * L),
    )
    corr_vmem = _vmem_limit_bytes(8 * B * tl + 4 * tl * tl)
    partials = pl.pallas_call(
        kernel,
        out_shape=jax.ShapeDtypeStruct((nt, 1), jnp.float32),
        grid_spec=pltpu.PrefetchScalarGridSpec(
            num_scalar_prefetch=0,
            grid=(nt, nt),
            in_specs=[
                pl.BlockSpec((tl, B), lambda i, j: (i, 0)),  # x1n^T tile i
                pl.BlockSpec((B, tl), lambda i, j: (0, j)),  # x2n tile j
            ],
            out_specs=pl.BlockSpec((1, 1), lambda i, j: (i, 0)),
            scratch_shapes=[
                pltpu.VMEM((tl, tl), jnp.float32),   # sum(c^2) accumulator
                pltpu.SMEM((2,), jnp.float32),       # (on_diag, diag_sq) for tile i
            ],
        ),
        compiler_params=pltpu.CompilerParams(
            # i-tiles are independent (per-i partial outputs) -> megacore on v7x.
            dimension_semantics=("parallel", "arbitrary"),
            vmem_limit_bytes=corr_vmem,
        ),
    )(x1n_t, x2n)

    return jnp.sum(partials)


def _reference(x1, x2, scale_loss=1.0, lambd=0.1):
    B, L = x1.shape

    def bn(x):
        m = jnp.mean(x, axis=0, keepdims=True)
        v = jnp.mean((x - m) ** 2, axis=0, keepdims=True)
        return (x - m) * lax.rsqrt(v + _EPS)

    x1n = bn(x1.astype(jnp.float32))
    x2n = bn(x2.astype(jnp.float32))
    c = x1n.T @ x2n / B / L
    diag = jnp.diagonal(c)
    on_diag = jnp.sum((diag - 1.0) ** 2) * scale_loss
    off_diag = (jnp.sum(c ** 2) - jnp.sum(diag ** 2)) * scale_loss
    return on_diag + lambd * off_diag


if __name__ == "__main__":
    B, L = 8, 256  # small demo shape; L multiple of 128 -> tl = 256, nt = 1
    key = jax.random.PRNGKey(0)
    k1, k2 = jax.random.split(key)
    x1 = jax.random.normal(k1, (B, L), dtype=jnp.float32)
    x2 = jax.random.normal(k2, (B, L), dtype=jnp.float32)

    loss = barlow_twins_loss(x1, x2, scale_loss=1.0, lambd=0.1)
    loss = jax.block_until_ready(loss)

    ref = _reference(x1, x2, scale_loss=1.0, lambd=0.1)
    # bf16 MXU inputs (f32 accumulation) -> slightly looser tolerance.
    assert jnp.allclose(loss, ref, rtol=1e-2, atol=1e-3), (loss, ref)

    print("KERNEL_OK")
</pallas_src>

<mosaic_0001>
module attributes {stable_mosaic.version = 11 : i64} {
  func.func @_bn_kernel(%arg0: i32, %arg1: memref<8x256xf32, #tpu.memory_space<vmem>>, %arg2: memref<8x256xf32, #tpu.memory_space<vmem>>, %arg3: memref<256x8xbf16, #tpu.memory_space<vmem>>, %arg4: memref<8x256xbf16, #tpu.memory_space<vmem>>) attributes {dimension_semantics = [#tpu.dimension_semantics<parallel>], iteration_bounds = array<i64: 1>, scalar_prefetch = 0 : i64, scratch_operands = 0 : i64, tpu.core_type = #tpu.core_type<tc>, window_params = [{transform_indices = @transform_0, window_bounds = array<i64: 8, 256>}, {transform_indices = @transform_1, window_bounds = array<i64: 8, 256>}, {transform_indices = @transform_2, window_bounds = array<i64: 256, 8>}, {transform_indices = @transform_3, window_bounds = array<i64: 8, 256>}]} {
    %c0 = arith.constant 0 : index
    %c0_0 = arith.constant 0 : index
    %0 = vector.load %arg1[%c0, %c0_0] : memref<8x256xf32, #tpu.memory_space<vmem>>, vector<8x256xf32>
    %cst = arith.constant dense<0.000000e+00> : vector<256xf32>
    %1 = vector.multi_reduction <add>, %0, %cst [0] : vector<8x256xf32> to vector<256xf32>
    %2 = vector.shape_cast %1 : vector<256xf32> to vector<1x256xf32>
    %cst_1 = arith.constant 8.000000e+00 : f32
    %3 = vector.broadcast %cst_1 : f32 to vector<1x256xf32>
    %4 = arith.divf %2, %3 : vector<1x256xf32>
    %5 = vector.broadcast %4 : vector<1x256xf32> to vector<8x256xf32>
    %6 = arith.subf %0, %5 : vector<8x256xf32>
    %7 = arith.mulf %6, %6 : vector<8x256xf32>
    %cst_2 = arith.constant dense<0.000000e+00> : vector<256xf32>
    %8 = vector.multi_reduction <add>, %7, %cst_2 [0] : vector<8x256xf32> to vector<256xf32>
    %9 = vector.shape_cast %8 : vector<256xf32> to vector<1x256xf32>
    %cst_3 = arith.constant 8.000000e+00 : f32
    %10 = vector.broadcast %cst_3 : f32 to vector<1x256xf32>
    %11 = arith.divf %9, %10 : vector<1x256xf32>
    %12 = vector.broadcast %4 : vector<1x256xf32> to vector<8x256xf32>
    %13 = arith.subf %0, %12 : vector<8x256xf32>
    %cst_4 = arith.constant 9.99999974E-6 : f32
    %14 = vector.broadcast %cst_4 : f32 to vector<1x256xf32>
    %15 = arith.addf %11, %14 : vector<1x256xf32>
    %16 = math.rsqrt %15 : vector<1x256xf32>
    %17 = vector.broadcast %16 : vector<1x256xf32> to vector<8x256xf32>
    %18 = arith.mulf %13, %17 : vector<8x256xf32>
    %c0_5 = arith.constant 0 : index
    %c0_6 = arith.constant 0 : index
    %19 = vector.load %arg2[%c0_5, %c0_6] : memref<8x256xf32, #tpu.memory_space<vmem>>, vector<8x256xf32>
    %cst_7 = arith.constant dense<0.000000e+00> : vector<256xf32>
    %20 = vector.multi_reduction <add>, %19, %cst_7 [0] : vector<8x256xf32> to vector<256xf32>
    %21 = vector.shape_cast %20 : vector<256xf32> to vector<1x256xf32>
    %cst_8 = arith.constant 8.000000e+00 : f32
    %22 = vector.broadcast %cst_8 : f32 to vector<1x256xf32>
    %23 = arith.divf %21, %22 : vector<1x256xf32>
    %24 = vector.broadcast %23 : vector<1x256xf32> to vector<8x256xf32>
    %25 = arith.subf %19, %24 : vector<8x256xf32>
    %26 = arith.mulf %25, %25 : vector<8x256xf32>
    %cst_9 = arith.constant dense<0.000000e+00> : vector<256xf32>
    %27 = vector.multi_reduction <add>, %26, %cst_9 [0] : vector<8x256xf32> to vector<256xf32>
    %28 = vector.shape_cast %27 : vector<256xf32> to vector<1x256xf32>
    %cst_10 = arith.constant 8.000000e+00 : f32
    %29 = vector.broadcast %cst_10 : f32 to vector<1x256xf32>
    %30 = arith.divf %28, %29 : vector<1x256xf32>
    %31 = vector.broadcast %23 : vector<1x256xf32> to vector<8x256xf32>
    %32 = arith.subf %19, %31 : vector<8x256xf32>
    %cst_11 = arith.constant 9.99999974E-6 : f32
    %33 = vector.broadcast %cst_11 : f32 to vector<1x256xf32>
    %34 = arith.addf %30, %33 : vector<1x256xf32>
    %35 = math.rsqrt %34 : vector<1x256xf32>
    %36 = vector.broadcast %35 : vector<1x256xf32> to vector<8x256xf32>
    %37 = arith.mulf %32, %36 : vector<8x256xf32>
    %38 = tpu.transpose %18, [1, 0] : vector<8x256xf32> -> vector<256x8xf32>
    %39 = arith.truncf %38 : vector<256x8xf32> to vector<256x8xbf16>
    %c0_12 = arith.constant 0 : index
    %c0_13 = arith.constant 0 : index
    %40 = vector.load %arg3[%c0_12, %c0_13] : memref<256x8xbf16, #tpu.memory_space<vmem>>, vector<256x8xbf16>
    tpu.vector_store %arg3[%c0_12, %c0_13], %39 {strides = array<i32>} : memref<256x8xbf16, #tpu.memory_space<vmem>>, vector<256x8xbf16>,
    %41 = arith.truncf %37 : vector<8x256xf32> to vector<8x256xbf16>
    %c0_14 = arith.constant 0 : index
    %c0_15 = arith.constant 0 : index
    %42 = vector.load %arg4[%c0_14, %c0_15] : memref<8x256xbf16, #tpu.memory_space<vmem>>, vector<8x256xbf16>
    tpu.vector_store %arg4[%c0_14, %c0_15], %41 {strides = array<i32>} : memref<8x256xbf16, #tpu.memory_space<vmem>>, vector<8x256xbf16>,
    return
  }
  func.func @transform_0(%arg0: i32) -> (i32, i32) {
    %c0_i32 = arith.constant 0 : i32
    %c0_i32_0 = arith.constant 0 : i32
    return %c0_i32, %arg0 : i32, i32
  }
  func.func @transform_1(%arg0: i32) -> (i32, i32) {
    %c0_i32 = arith.constant 0 : i32
    %c0_i32_0 = arith.constant 0 : i32
    return %c0_i32, %arg0 : i32, i32
  }
  func.func @transform_2(%arg0: i32) -> (i32, i32) {
    %c0_i32 = arith.constant 0 : i32
    %c0_i32_0 = arith.constant 0 : i32
    return %arg0, %c0_i32 : i32, i32
  }
  func.func @transform_3(%arg0: i32) -> (i32, i32) {
    %c0_i32 = arith.constant 0 : i32
    %c0_i32_0 = arith.constant 0 : i32
    return %c0_i32, %arg0 : i32, i32
  }
}

</mosaic_0001>

<bundles_post_ra>
// kernel: tpu_custom_call.1
= control target key start
LH: loop header
LB: loop body
LE: loop exit
PB: predicated region body
PF: predicated region fallthrough
CT: control target
= control target key end

     0   :  { %9 = vsyncpa [#allocation3], 0  ;;  %s792_s0 = inlined_call_operand.hbm [shape: f32[8,256], index: 0, kind: input, shape index: {}]   ;;  %s793_s1 = inlined_call_operand.hbm [shape: f32[8,256], index: 1, kind: input, shape index: {}]   ;;  %s794_s2 = inlined_call_operand.vmem [shape: bf16[256,8], index: 2, kind: output, shape index: {0}]   ;;  %s795_s3 = inlined_call_operand.hbm [shape: bf16[8,256], index: 3, kind: output, shape index: {1}]  }
   0x1   :  { %10 = vsyncpa [#allocation6], 0 }
   0x2   :  { %11 = vsyncpa [#allocation4], 0  ;;  %s605_s12 = smov [#allocation2]   ;;  %s606_s14 = smov [#allocation5]  }
   0x3   :  { %s18_s13 = sshll.u32 %s605_s12, 4  ;;  %s28_s15 = sshll.u32 %s606_s14, 4  ;;  %s19_s13 = int_to_ptr.vmem [resolvable:$true] %s18_s13  ;;  %s29_s15 = int_to_ptr.vmem [resolvable:$true] %s28_s15 }
   0x4   :  { %s533_s18 = scalar_lea.hbm %s792_s0, 256 }
   0x5   :  { %p534_p0 = scmp.ne.s32.totalorder %s792_s0, %s533_s18  ;;  %p537_p1 = scmp.lt.u32.totalorder %s533_s18, %s792_s0 }
   0x7   :  { %p539_p2 = pnand %p537_p1, %p534_p0 }
   0x9   :  { %542 = shalt.err (!%p539_p2)
}
   0xa   :  { %s543_s23 = scalar_lea.vmem %s19_s13, 256  ;;  %p548_p4 = scmp.lt.s32.totalorder %s19_s13, %s19_s13 }
   0xb   :  { %p544_p3 = scmp.ne.s32.totalorder %s19_s13, %s543_s23  ;;  %p549_p5 = scmp.lt.s32.totalorder %s543_s23, %s543_s23 }
   0xd   :  { %p550_p6 = por %p549_p5, %p548_p4 }
   0xf   :  { %p551_p7 = pnand %p550_p6, %p544_p3 }
  0x11   :  { %554 = shalt.err (!%p551_p7)
}
  0x12   :  { %21 = dma.hbm_to_vmem [thread:$0]  %s792_s0, 256, %s19_s13, [#allocation3]  }
  0x13   :  { %s555_s28 = scalar_lea.hbm %s793_s1, 256 }
  0x14   :  { %p556_p8 = scmp.ne.s32.totalorder %s793_s1, %s555_s28  ;;  %p559_p9 = scmp.lt.u32.totalorder %s555_s28, %s793_s1 }
  0x16   :  { %p561_p10 = pnand %p559_p9, %p556_p8 }
  0x18   :  { %564 = shalt.err (!%p561_p10)
}
  0x19   :  { %s565_s6 = scalar_lea.vmem %s29_s15, 256  ;;  %p570_p12 = scmp.lt.s32.totalorder %s29_s15, %s29_s15 }
  0x1a   :  { %p566_p11 = scmp.ne.s32.totalorder %s29_s15, %s565_s6  ;;  %p571_p13 = scmp.lt.s32.totalorder %s565_s6, %s565_s6 }
  0x1c   :  { %p572_p0 = por %p571_p13, %p570_p12 }
  0x1e   :  { %p573_p1 = pnand %p572_p0, %p566_p11 }
  0x20   :  { %576 = shalt.err (!%p573_p1)
}
  0x21   :  { %31 = dma.hbm_to_vmem [thread:$0]  %s793_s1, 256, %s29_s15, [#allocation6]  }
  0x22   :  { %599 = dma.done.wait [#allocation3], 256  }
  0x23   :  { %600 = vsyncadd [#allocation3], 4294967040 }
  0x24   :  { %601 = dma.done.wait [#allocation6], 256  }
  0x25   :  { %602 = vsyncadd [#allocation6], 4294967040  ;;  %v38_v0 = vld [vmem:[#allocation2] sm:$0xff]  ;;  %v39_v1 = vld [vmem:[#allocation2 + $0x8] sm:$0xff]  ;;  %s607_s1 = smov [#allocation7]  }
  0x26   :  { %v40_v2 = vrot.slane %v38_v0, 4  ;;  %v46_v3 = vrot.slane %v39_v1, 4  ;;  %v79_v41 = vld [vmem:[#allocation5] sm:$0xff]  ;;  %v80_v42 = vld [vmem:[#allocation5 + $0x8] sm:$0xff]  ;;  %s361_s8 = sshll.u32 %s607_s1, 4  ;;  %s362_s8 = int_to_ptr.vmem [resolvable:$true] %s361_s8 }
  0x27   :  { %v81_v43 = vrot.slane %v79_v41, 4  ;;  %v87_v44 = vrot.slane %v80_v42, 4  ;;  %s577_s9 = scalar_lea.vmem %s362_s8, 128  ;;  %p582_p3 = scmp.lt.s32.totalorder %s362_s8, %s362_s8 }
  0x28   :  { %v41_v4 = vadd.f32 %v40_v2, %v38_v0  ;;  %v47_v5 = vadd.f32 %v46_v3, %v39_v1  ;;  %p578_p2 = scmp.ne.s32.totalorder %s362_s8, %s577_s9  ;;  %p583_p4 = scmp.lt.s32.totalorder %s577_s9, %s577_s9 }
  0x29   :  { %v82_v45 = vadd.f32 %v81_v43, %v79_v41  ;;  %v88_v46 = vadd.f32 %v87_v44, %v80_v42 }
  0x2a   :  { %v42_v6 = vrot.slane %v41_v4, 2  ;;  %v48_v7 = vrot.slane %v47_v5, 2  ;;  %p584_p5 = por %p583_p4, %p582_p3 }
  0x2b   :  { %v83_v47 = vrot.slane %v82_v45, 2  ;;  %v89_v48 = vrot.slane %v88_v46, 2 }
  0x2c   :  { %v43_v8 = vadd.f32 %v42_v6, %v41_v4  ;;  %v49_v9 = vadd.f32 %v48_v7, %v47_v5  ;;  %p585_p6 = pnand %p584_p5, %p578_p2 }
  0x2d   :  { %v84_v49 = vadd.f32 %v83_v47, %v82_v45  ;;  %v90_v50 = vadd.f32 %v89_v48, %v88_v46 }
  0x2e   :  { %v44_v10 = vrot.slane %v43_v8, 1  ;;  %v50_v11 = vrot.slane %v49_v9, 1 }
  0x2f   :  { %v85_v51 = vrot.slane %v84_v49, 1  ;;  %v91_v52 = vrot.slane %v90_v50, 1 }
  0x30   :  { %v45_v12 = vadd.f32 %v44_v10, %v43_v8  ;;  %v51_v13 = vadd.f32 %v50_v11, %v49_v9 }
  0x31   :  { %v86_v53 = vadd.f32 %v85_v51, %v84_v49  ;;  %v92_v54 = vadd.f32 %v91_v52, %v90_v50 }
  0x32   :  { %v53_v14 = vmul.f32 0.125, %v45_v12  ;;  %v54_v15 = vmul.f32 0.125, %v51_v13 }
  0x33   :  { %v93_v55 = vmul.f32 0.125, %v86_v53  ;;  %v94_v56 = vmul.f32 0.125, %v92_v54 }
  0x34   :  { %v55_v16 = vsub.f32 %v38_v0, %v53_v14  ;;  %v56_v17 = vsub.f32 %v39_v1, %v54_v15 }
  0x35   :  { %v95_v57 = vsub.f32 %v79_v41, %v93_v55  ;;  %v96_v58 = vsub.f32 %v80_v42, %v94_v56 }
  0x36   :  { %v57_v18 = vmul.f32 %v55_v16, %v55_v16  ;;  %v58_v19 = vmul.f32 %v56_v17, %v56_v17 }
  0x37   :  { %v97_v59 = vmul.f32 %v95_v57, %v95_v57  ;;  %v98_v60 = vmul.f32 %v96_v58, %v96_v58 }
  0x38   :  { %v59_v20 = vrot.slane %v57_v18, 4  ;;  %v65_v21 = vrot.slane %v58_v19, 4 }
  0x39   :  { %v99_v61 = vrot.slane %v97_v59, 4  ;;  %v105_v62 = vrot.slane %v98_v60, 4 }
  0x3a   :  { %v60_v22 = vadd.f32 %v59_v20, %v57_v18  ;;  %v66_v23 = vadd.f32 %v65_v21, %v58_v19 }
  0x3b   :  { %v100_v63 = vadd.f32 %v99_v61, %v97_v59  ;;  %v106_v0 = vadd.f32 %v105_v62, %v98_v60 }
  0x3c   :  { %v61_v24 = vrot.slane %v60_v22, 2  ;;  %v67_v25 = vrot.slane %v66_v23, 2 }
  0x3d   :  { %v101_v1 = vrot.slane %v100_v63, 2  ;;  %v107_v2 = vrot.slane %v106_v0, 2 }
  0x3e   :  { %v62_v26 = vadd.f32 %v61_v24, %v60_v22  ;;  %v68_v27 = vadd.f32 %v67_v25, %v66_v23 }
  0x3f   :  { %v102_v3 = vadd.f32 %v101_v1, %v100_v63  ;;  %v108_v4 = vadd.f32 %v107_v2, %v106_v0 }
  0x40   :  { %v63_v28 = vrot.slane %v62_v26, 1  ;;  %v69_v29 = vrot.slane %v68_v27, 1 }
  0x41   :  { %v103_v5 = vrot.slane %v102_v3, 1  ;;  %v109_v6 = vrot.slane %v108_v4, 1 }
  0x42   :  { %v64_v30 = vadd.f32 %v63_v28, %v62_v26  ;;  %v70_v31 = vadd.f32 %v69_v29, %v68_v27 }
  0x43   :  { %v104_v7 = vadd.f32 %v103_v5, %v102_v3  ;;  %v110_v8 = vadd.f32 %v109_v6, %v108_v4 }
  0x44   :  { %v71_v32 = vmul.f32 0.125, %v64_v30  ;;  %v72_v33 = vmul.f32 0.125, %v70_v31 }
  0x45   :  { %v111_v9 = vmul.f32 0.125, %v104_v7  ;;  %v112_v10 = vmul.f32 0.125, %v110_v8 }
  0x46   :  { %v73_v34 = vadd.f32 1e-05, %v71_v32  ;;  %v74_v35 = vadd.f32 1e-05, %v72_v33 }
  0x47   :  { %v113_v11 = vadd.f32 1e-05, %v111_v9  ;;  %v114_v12 = vadd.f32 1e-05, %v112_v10 }
  0x48   :  { %525 = vrsqrt.f32 %v73_v34 }
  0x49   :  { %527 = vrsqrt.f32 %v74_v35 }
  0x4a   :  { %529 = vrsqrt.f32 %v113_v11 }
  0x4b   :  { %531 = vrsqrt.f32 %v114_v12 }
  0x52   :  { %v526_v36 = vpop.eup %525 }
  0x53   :  { %v528_v37 = vpop.eup %527  ;;  %v77_v38 = vmul.f32 %v526_v36, %v55_v16 }
  0x54   :  { %v78_v39 = vmul.f32 %v528_v37, %v56_v17  ;;  %v530_v13 = vpop.eup %529 }
  0x55   :  { %v532_v14 = vpop.eup %531  ;;  %v117_v15 = vmul.f32 %v530_v13, %v95_v57 }
  0x56   :  { %v443_v40 = vpack.i.bf16 %v78_v39, %v77_v38  ;;  %v118_v16 = vmul.f32 %v532_v14, %v96_v58 }
  0x58   :  { %444 = vxpose.xlu0.b32.start.end [1/1] (short) %v443_v40, 128  ;;  %v438_v17 = vpack.c.bf16 %v118_v16, %v117_v15 }
  0x5a   :  { %352 = vst [vmem:[#allocation7] sm:$0xff] %v438_v17 }
  0x5b   :  { %588 = shalt.err (!%p585_p6)
}
  0x5c   :  { %s589_s12 = scalar_lea.hbm %s795_s3, 128 }
  0x5d   :  { %p590_p7 = scmp.ne.s32.totalorder %s795_s3, %s589_s12  ;;  %p593_p8 = scmp.lt.u32.totalorder %s589_s12, %s795_s3 }
  0x5f   :  { %p595_p9 = pnand %p593_p8, %p590_p7 }
  0x61   :  { %598 = shalt.err (!%p595_p9)
}
  0x62   :  { %364 = dma.vmem_to_hbm [thread:$0]  %s362_s8, 128, %s795_s3, [#allocation4]   ;;  %vm311_vm0 = vcmask 60416  }
  0xd8   :  { %v445_v18 = vpop.trf.xlu0 }
  0xd9   :  { %v449_v19 = vunpack.i.h.bf16 %v445_v18  ;;  %v446_v20 = vunpack.i.l.bf16 %v445_v18 }
  0xdb   :  { %v422_v21 = vpack.c.bf16 %v449_v19, %v449_v19  ;;  %v406_v22 = vpack.c.bf16 %v446_v20, %v446_v20 }
  0xdc   :  { %v450_v23 = vpop.trf.xlu0 }
  0xdd   :  { %328 = vst.msk [vmem:[%s794_s2 + $0x40] sm:$0xf] %vm311_vm0, %v422_v21  ;;  %312 = vst.msk [vmem:[%s794_s2] sm:$0xf] %vm311_vm0, %v406_v22  ;;  %v454_v24 = vunpack.i.h.bf16 %v450_v23  ;;  %v451_v25 = vunpack.i.l.bf16 %v450_v23 }
  0xdf   :  { %v423_v26 = vpack.c.bf16 %v454_v24, %v454_v24  ;;  %v407_v27 = vpack.c.bf16 %v451_v25, %v451_v25 }
  0xe0   :  { %v455_v28 = vpop.trf.xlu0 }
  0xe1   :  { %329 = vst.msk [vmem:[%s794_s2 + $0x44] sm:$0xf] %vm311_vm0, %v423_v26  ;;  %313 = vst.msk [vmem:[%s794_s2 + $0x4] sm:$0xf] %vm311_vm0, %v407_v27  ;;  %v459_v29 = vunpack.i.h.bf16 %v455_v28  ;;  %v456_v30 = vunpack.i.l.bf16 %v455_v28 }
  0xe3   :  { %v424_v31 = vpack.c.bf16 %v459_v29, %v459_v29  ;;  %v408_v32 = vpack.c.bf16 %v456_v30, %v456_v30 }
  0xe4   :  { %v460_v33 = vpop.trf.xlu0 }
  0xe5   :  { %330 = vst.msk [vmem:[%s794_s2 + $0x48] sm:$0xf] %vm311_vm0, %v424_v31  ;;  %314 = vst.msk [vmem:[%s794_s2 + $0x8] sm:$0xf] %vm311_vm0, %v408_v32  ;;  %v464_v34 = vunpack.i.h.bf16 %v460_v33  ;;  %v461_v35 = vunpack.i.l.bf16 %v460_v33 }
  0xe7   :  { %v425_v36 = vpack.c.bf16 %v464_v34, %v464_v34  ;;  %v409_v37 = vpack.c.bf16 %v461_v35, %v461_v35 }
  0xe8   :  { %v465_v38 = vpop.trf.xlu0 }
  0xe9   :  { %331 = vst.msk [vmem:[%s794_s2 + $0x4c] sm:$0xf] %vm311_vm0, %v425_v36  ;;  %315 = vst.msk [vmem:[%s794_s2 + $0xc] sm:$0xf] %vm311_vm0, %v409_v37  ;;  %v469_v39 = vunpack.i.h.bf16 %v465_v38  ;;  %v466_v40 = vunpack.i.l.bf16 %v465_v38 }
  0xeb   :  { %v426_v41 = vpack.c.bf16 %v469_v39, %v469_v39  ;;  %v410_v42 = vpack.c.bf16 %v466_v40, %v466_v40 }
  0xec   :  { %v470_v43 = vpop.trf.xlu0 }
  0xed   :  { %332 = vst.msk [vmem:[%s794_s2 + $0x50] sm:$0xf] %vm311_vm0, %v426_v41  ;;  %316 = vst.msk [vmem:[%s794_s2 + $0x10] sm:$0xf] %vm311_vm0, %v410_v42  ;;  %v474_v44 = vunpack.i.h.bf16 %v470_v43  ;;  %v471_v45 = vunpack.i.l.bf16 %v470_v43 }
  0xef   :  { %v427_v46 = vpack.c.bf16 %v474_v44, %v474_v44  ;;  %v411_v47 = vpack.c.bf16 %v471_v45, %v471_v45 }
  0xf0   :  { %v475_v48 = vpop.trf.xlu0 }
  0xf1   :  { %333 = vst.msk [vmem:[%s794_s2 + $0x54] sm:$0xf] %vm311_vm0, %v427_v46  ;;  %317 = vst.msk [vmem:[%s794_s2 + $0x14] sm:$0xf] %vm311_vm0, %v411_v47  ;;  %v479_v49 = vunpack.i.h.bf16 %v475_v48  ;;  %v476_v50 = vunpack.i.l.bf16 %v475_v48 }
  0xf3   :  { %v428_v51 = vpack.c.bf16 %v479_v49, %v479_v49  ;;  %v412_v52 = vpack.c.bf16 %v476_v50, %v476_v50 }
  0xf4   :  { %v480_v53 = vpop.trf.xlu0 }
  0xf5   :  { %334 = vst.msk [vmem:[%s794_s2 + $0x58] sm:$0xf] %vm311_vm0, %v428_v51  ;;  %318 = vst.msk [vmem:[%s794_s2 + $0x18] sm:$0xf] %vm311_vm0, %v412_v52  ;;  %v484_v54 = vunpack.i.h.bf16 %v480_v53  ;;  %v481_v55 = vunpack.i.l.bf16 %v480_v53 }
  0xf7   :  { %v429_v56 = vpack.c.bf16 %v484_v54, %v484_v54  ;;  %v413_v57 = vpack.c.bf16 %v481_v55, %v481_v55 }
  0xf8   :  { %v485_v58 = vpop.trf.xlu0 }
  0xf9   :  { %335 = vst.msk [vmem:[%s794_s2 + $0x5c] sm:$0xf] %vm311_vm0, %v429_v56  ;;  %319 = vst.msk [vmem:[%s794_s2 + $0x1c] sm:$0xf] %vm311_vm0, %v413_v57  ;;  %v489_v59 = vunpack.i.h.bf16 %v485_v58  ;;  %v486_v60 = vunpack.i.l.bf16 %v485_v58 }
  0xfb   :  { %v430_v61 = vpack.c.bf16 %v489_v59, %v489_v59  ;;  %v414_v62 = vpack.c.bf16 %v486_v60, %v486_v60 }
  0xfc   :  { %v490_v63 = vpop.trf.xlu0 }
  0xfd   :  { %336 = vst.msk [vmem:[%s794_s2 + $0x60] sm:$0xf] %vm311_vm0, %v430_v61  ;;  %320 = vst.msk [vmem:[%s794_s2 + $0x20] sm:$0xf] %vm311_vm0, %v414_v62  ;;  %v494_v0 = vunpack.i.h.bf16 %v490_v63  ;;  %v491_v1 = vunpack.i.l.bf16 %v490_v63 }
  0xff   :  { %v431_v2 = vpack.c.bf16 %v494_v0, %v494_v0  ;;  %v415_v3 = vpack.c.bf16 %v491_v1, %v491_v1 }
 0x100   :  { %v495_v4 = vpop.trf.xlu0 }
 0x101   :  { %337 = vst.msk [vmem:[%s794_s2 + $0x64] sm:$0xf] %vm311_vm0, %v431_v2  ;;  %321 = vst.msk [vmem:[%s794_s2 + $0x24] sm:$0xf] %vm311_vm0, %v415_v3  ;;  %v499_v5 = vunpack.i.h.bf16 %v495_v4  ;;  %v496_v6 = vunpack.i.l.bf16 %v495_v4 }
 0x103   :  { %v432_v7 = vpack.c.bf16 %v499_v5, %v499_v5  ;;  %v416_v8 = vpack.c.bf16 %v496_v6, %v496_v6 }
 0x104   :  { %v500_v9 = vpop.trf.xlu0 }
 0x105   :  { %338 = vst.msk [vmem:[%s794_s2 + $0x68] sm:$0xf] %vm311_vm0, %v432_v7  ;;  %322 = vst.msk [vmem:[%s794_s2 + $0x28] sm:$0xf] %vm311_vm0, %v416_v8  ;;  %v504_v10 = vunpack.i.h.bf16 %v500_v9  ;;  %v501_v11 = vunpack.i.l.bf16 %v500_v9 }
 0x107   :  { %v433_v12 = vpack.c.bf16 %v504_v10, %v504_v10  ;;  %v417_v13 = vpack.c.bf16 %v501_v11, %v501_v11 }
 0x108   :  { %v505_v14 = vpop.trf.xlu0 }
 0x109   :  { %339 = vst.msk [vmem:[%s794_s2 + $0x6c] sm:$0xf] %vm311_vm0, %v433_v12  ;;  %323 = vst.msk [vmem:[%s794_s2 + $0x2c] sm:$0xf] %vm311_vm0, %v417_v13  ;;  %v509_v15 = vunpack.i.h.bf16 %v505_v14  ;;  %v506_v16 = vunpack.i.l.bf16 %v505_v14 }
 0x10b   :  { %v434_v17 = vpack.c.bf16 %v509_v15, %v509_v15  ;;  %v418_v18 = vpack.c.bf16 %v506_v16, %v506_v16 }
 0x10c   :  { %v510_v19 = vpop.trf.xlu0 }
 0x10d   :  { %340 = vst.msk [vmem:[%s794_s2 + $0x70] sm:$0xf] %vm311_vm0, %v434_v17  ;;  %324 = vst.msk [vmem:[%s794_s2 + $0x30] sm:$0xf] %vm311_vm0, %v418_v18  ;;  %v514_v20 = vunpack.i.h.bf16 %v510_v19  ;;  %v511_v21 = vunpack.i.l.bf16 %v510_v19 }
 0x10f   :  { %v435_v22 = vpack.c.bf16 %v514_v20, %v514_v20  ;;  %v419_v23 = vpack.c.bf16 %v511_v21, %v511_v21 }
 0x110   :  { %v515_v24 = vpop.trf.xlu0 }
 0x111   :  { %341 = vst.msk [vmem:[%s794_s2 + $0x74] sm:$0xf] %vm311_vm0, %v435_v22  ;;  %325 = vst.msk [vmem:[%s794_s2 + $0x34] sm:$0xf] %vm311_vm0, %v419_v23  ;;  %v519_v25 = vunpack.i.h.bf16 %v515_v24  ;;  %v516_v26 = vunpack.i.l.bf16 %v515_v24 }
 0x113   :  { %v436_v27 = vpack.c.bf16 %v519_v25, %v519_v25  ;;  %v420_v28 = vpack.c.bf16 %v516_v26, %v516_v26 }
 0x114   :  { %v520_v29 = vpop.trf.xlu0 }
 0x115   :  { %342 = vst.msk [vmem:[%s794_s2 + $0x78] sm:$0xf] %vm311_vm0, %v436_v27  ;;  %326 = vst.msk [vmem:[%s794_s2 + $0x38] sm:$0xf] %vm311_vm0, %v420_v28  ;;  %v524_v30 = vunpack.i.h.bf16 %v520_v29  ;;  %v521_v31 = vunpack.i.l.bf16 %v520_v29 }
 0x117   :  { %v437_v32 = vpack.c.bf16 %v524_v30, %v524_v30  ;;  %v421_v33 = vpack.c.bf16 %v521_v31, %v521_v31 }
 0x119   :  { %343 = vst.msk [vmem:[%s794_s2 + $0x7c] sm:$0xf] %vm311_vm0, %v437_v32  ;;  %327 = vst.msk [vmem:[%s794_s2 + $0x3c] sm:$0xf] %vm311_vm0, %v421_v33 }
 0x11a   :  { %603 = dma.done.wait [#allocation4], 128  }
 0x11b   :  { %604 = vsyncadd [#allocation4], 4294967168 }
 0x11c   :  { %370 = vsyncpa [#allocation3], 1 }
 0x11d   :  { %371 = vsyncpa [#allocation6], 1 }
 0x11e   :  { %372 = vsyncpa [#allocation4], 1 }

</bundles_post_ra>
